<compile_context>
chip_gen: v7x
topology: tpu7x:2x2x1
jax: 0.10.0
libtpu: 0.0.40
codegen_flags: <defaults>
</compile_context>

<pallas_src>
import jax
import jax.numpy as jnp
from jax.experimental import pallas as pl
from jax.experimental.pallas import tpu as pltpu

V_STAR = 15.0
S_STAR = 20.0
BIAS = 0.0                      # module's `bias`
U_MIN = -5.0
CF_PARAMS = (1.2566, 1.5, 0.9)  # car_following_parameters (FW1 == FW2)

LANE = 128
NSIG = 9          # s_i, v_i, v_im, s_f1, v_f1, s_f2, v_f2, u_nom, accel_cav
NPARAM = 14
# 1024 rows * 128 lanes/tile: (9*4.5 MiB in + 0.5 MiB out) double-buffered ~= 10 MiB.
# Fits the v5e 16 MiB scoped-VMEM default; do not exceed 1024 on v5e without raising
# vmem_limit_bytes (v6e/v7x can go to 2048 under their 32 MiB defaults).
TILE_ROWS = 1024


def _barrier_kernel(params_ref, x_ref, o_ref):
    # ---- hoisted scalars (SMEM) ----
    t     = params_ref[0]          # tau
    g0    = params_ref[1]
    g1    = params_ref[2]
    g2    = params_ref[3]
    k1    = params_ref[4]
    inv_t = params_ref[5]          # 1 / tau                 (precondition: tau > 0)
    c_b   = params_ref[6]          # -tau / (1 + tau^2)
    c_d   = params_ref[7]          # -tau / (1 + 2*tau^2)
    c_q   = params_ref[8]          # tau^2 / (1 + tau^2)
    tc0   = params_ref[9]          # tau * cf0
    a_vf  = params_ref[10]         # tau * cf1 - 1
    b_v   = params_ref[11]         # 1 - tau * cf2
    lf_c  = params_ref[12]         # tau*(cf0*S_STAR - cf1*V_STAR + cf2*V_STAR)
    cb_c  = params_ref[13]         # -k1 * tau * U_MIN

    # ---- lane-dense signal planes, each (tile_rows, 128) ----
    # Learning_CBF=False -> La_FV1 = La_FV2 = 0 ; SIDE_enabled=False -> cf_saturation = 0

    # Upper-bound constraints first so accel / h0 / h3 die early (less vreg pressure).
    v_i   = x_ref[1]
    v_im  = x_ref[2]
    dv    = v_im - v_i                                   # Lfh1, reused by h3 / h1 / h2
    u_nom = x_ref[7]
    tun   = t * u_nom                                    # |Lgh| * u_nominal
    s_i   = x_ref[0]
    h0 = g0 * (s_i - t * v_i) + dv - tun                 # cbf_h[:, 0]   (BIAS == 0)
    h3 = x_ref[8] + k1 * dv + cb_c - u_nom               # control_bound
    u_upper = jnp.minimum(inv_t * h0, h3)                # requires tau > 0 (time step)

    # Hinge constraints h1, h2 (gamma alpha terms + Lfh with folded coefficients).
    base = lf_c + tun - dv
    s_f1 = x_ref[3]
    v_f1 = x_ref[4]
    h1 = (g1 * ((s_f1 - s_i) - t * (v_f1 - v_i))
          + base + b_v * v_i + a_vf * v_f1 - tc0 * s_f1)          # cbf_h[:, 1]
    s_f2 = x_ref[5]
    v_f2 = x_ref[6]
    h2 = (g2 * ((s_f2 - s_i) - t * (v_f2 - v_i))
          + base + b_v * v_f1 + a_vf * v_f2 - tc0 * s_f2)         # cbf_h[:, 2]

    # ---- exact solve of: min 0.5||u||^2  s.t.  G u <= h  (replaces qpth QPFunction) ----
    # Constraints: tau*u0 <= h0 ; -tau*u0 - u1 <= h1 ; -tau*u0 - u2 <= h2 ; u0 <= h3.
    # Optimal slacks u_i = max(0, -h_i - tau*u0); the 1-D convex piecewise quadratic in
    # u0 is solved by KKT case analysis.  Condition tests simplified algebraically:
    #   "-h1 - tau*u_b > 0"  <=>  h1 < 0
    #   "-h2 - tau*u_b <= 0" <=>  c_q*h1 <= h2
    #   "-h1 - tau*u_d > 0"  <=>  c_q*h2 > h1   (and symmetrically for the other test)
    cqh1 = c_q * h1
    cqh2 = c_q * h2
    a1 = h1 >= 0.0
    d2 = cqh1 > h2
    cond_a = jnp.logical_and(a1, h2 >= 0.0)              # no hinge active -> u0 = 0
    cond_d = jnp.logical_and(cqh2 > h1, d2)              # both hinges active
    cond_b = jnp.logical_and(jnp.logical_not(a1),        # only hinge 1 active
                             jnp.logical_not(d2))
    u_hinge = jnp.where(cond_d, c_d * (h1 + h2),
                        c_b * jnp.where(cond_b, h1, h2))
    u_free = jnp.where(cond_a, 0.0, u_hinge)
    o_ref[...] = jnp.minimum(u_free, u_upper).astype(o_ref.dtype)


def _pack_params(tau, gamma, k1):
    t = jnp.asarray(tau, jnp.float32)
    g = jnp.asarray(gamma, jnp.float32).reshape(-1)
    k1v = jnp.asarray(k1, jnp.float32).reshape(-1)[0]
    c0, c1, c2 = CF_PARAMS
    t2 = t * t
    return jnp.stack([
        t, g[0], g[1], g[2], k1v,
        1.0 / t,                                         # inv_t
        -t / (1.0 + t2),                                 # c_b
        -t / (1.0 + 2.0 * t2),                           # c_d
        t2 / (1.0 + t2),                                 # c_q
        t * c0,                                          # tc0
        t * c1 - 1.0,                                    # a_vf
        1.0 - t * c2,                                    # b_v
        t * (c0 * S_STAR - c1 * V_STAR + c2 * V_STAR),   # lf_c
        -k1v * t * U_MIN,                                # cb_c
    ]).astype(jnp.float32)


def _pack_signals(u_nominal, states, acceleration, cav_index):
    """Gather the 9 per-batch signals into one (NSIG, B) f32 slab (lane-dense batch)."""
    ci = cav_index
    B = states.shape[0]
    states = states.astype(jnp.float32)
    return jnp.stack([
        states[:, ci],                                   # s_i
        states[:, ci + 4],                               # v_i
        states[:, ci + 3],                               # v_im
        states[:, ci + 1],                               # s_f1
        states[:, ci + 5],                               # v_f1
        states[:, ci + 2],                               # s_f2
        states[:, ci + 6],                               # v_f2
        u_nominal.astype(jnp.float32).reshape(B),        # u_nominal
        acceleration.astype(jnp.float32)[:, ci],         # acceleration[:, CAV_index-1+1]
    ], axis=0)                                           # (NSIG, B)


def barrier_layer_packed(params, x, *, tile_rows=TILE_ROWS,
                         dimension_semantics=("parallel",)):
    """Pallas core: params (NPARAM,) f32, x (NSIG, rows, 128) f32 lane-dense slab.
    Returns the (rows, 128) control tile.  Callers that already keep signals in this
    layout avoid the wrapper-side repack entirely."""
    nsig, rows, lane = x.shape
    assert nsig == NSIG and lane == LANE
    tile = max(8, (int(tile_rows) // 8) * 8)
    if rows <= tile:
        tile = rows                      # single block == full array (no alignment req)
    num_tiles = -(-rows // tile)         # last block may be partial (Pallas masks it)

    return pl.pallas_call(
        _barrier_kernel,
        out_shape=jax.ShapeDtypeStruct((rows, LANE), jnp.float32),
        grid=(num_tiles,),
        in_specs=[
            pl.BlockSpec(memory_space=pltpu.MemorySpace.SMEM),           # params
            pl.BlockSpec((NSIG, tile, LANE), lambda r: (0, r, 0)),        # signals
        ],
        out_specs=pl.BlockSpec((tile, LANE), lambda r: (r, 0)),
        compiler_params=pltpu.CompilerParams(
            dimension_semantics=dimension_semantics),
        # TODO(synk): on v7x, confirm in the trace that both TensorCores stream the
        # batch axis; if only one TC is active, switch to (pltpu.CORE_PARALLEL,).
    )(params, x)


def barrier_layer_reference(u_nominal, states, acceleration, tau, gamma, k1, cav_index=1):
    """Pure-jnp forward (small-B fast path and correctness reference)."""
    ci = cav_index
    states = states.astype(jnp.float32)
    s_i, v_i = states[:, ci], states[:, ci + 4]
    v_im = states[:, ci + 3]
    s_f1, v_f1 = states[:, ci + 1], states[:, ci + 5]
    s_f2, v_f2 = states[:, ci + 2], states[:, ci + 6]
    u_nom = u_nominal.astype(jnp.float32).reshape(-1)
    accel = acceleration.astype(jnp.float32)[:, ci]
    g = jnp.asarray(gamma, jnp.float32).reshape(-1)
    k1v = jnp.asarray(k1, jnp.float32).reshape(-1)[0]
    c0, c1, c2 = CF_PARAMS
    t = jnp.asarray(tau, jnp.float32)

    lfh1 = v_im - v_i
    lfh2 = (-v_im + 2.0 * v_i - v_f1
            - t * (c0 * (s_f1 - S_STAR) - c1 * (v_f1 - V_STAR) + c2 * (v_i - V_STAR)))
    lfh3 = (-v_im + v_i + v_f1 - v_f2
            - t * (c0 * (s_f2 - S_STAR) - c1 * (v_f2 - V_STAR) + c2 * (v_f1 - V_STAR)))
    a1 = g[0] * (s_i - t * v_i) - BIAS
    a2 = g[1] * (s_f1 - s_i - t * (v_f1 - v_i))
    a3 = g[2] * (s_f2 - s_i - t * (v_f2 - v_i))
    h0 = a1 + lfh1 - t * u_nom
    h1 = a2 + lfh2 + t * u_nom
    h2 = a3 + lfh3 + t * u_nom
    h3 = accel + k1v * (v_im - v_i - t * U_MIN) - u_nom

    t2 = t * t
    u_b = -t * h1 / (1.0 + t2)
    u_c = -t * h2 / (1.0 + t2)
    u_d = -t * (h1 + h2) / (1.0 + 2.0 * t2)
    cond_a = jnp.logical_and(h1 >= 0.0, h2 >= 0.0)
    cond_d = jnp.logical_and(-h1 - t * u_d > 0.0, -h2 - t * u_d > 0.0)
    cond_b = jnp.logical_and(-h1 - t * u_b > 0.0, -h2 - t * u_b <= 0.0)
    u_free = jnp.where(cond_a, 0.0, jnp.where(cond_d, u_d, jnp.where(cond_b, u_b, u_c)))
    u0 = jnp.minimum(u_free, jnp.minimum(h0 / t, h3))
    return u0[:, None].astype(jnp.float32)


def barrier_layer(u_nominal, states, acceleration, tau, gamma, k1, cav_index=1,
                  use_pallas=None, tile_rows=TILE_ROWS):
    """BarrierLayer.forward (batched branch, Learning_CBF=False, SIDE_enabled=False,
    acceleration provided).  Returns u*[:, 0:1] of the barrier QP, shape (B, 1)."""
    B = states.shape[0]

    # Precondition of the module's QP assembly (tau is a positive time step).
    # For traced tau this is a documented precondition (inv_t / h0 bound assume tau>0).
    if isinstance(tau, (int, float)) and float(tau) <= 0.0:
        raise ValueError("BarrierLayer requires tau > 0 (upper bound h0/tau).")

    if use_pallas is None:
        use_pallas = B >= 1024   # per-grid-step overhead dominates tiny batches
    if not use_pallas:
        return barrier_layer_reference(u_nominal, states, acceleration, tau, gamma, k1,
                                       cav_index=cav_index)

    params = _pack_params(tau, gamma, k1)                             # (14,) f32 -> SMEM
    sig = _pack_signals(u_nominal, states, acceleration, cav_index)   # (9, B) f32

    # Lane-dense layout: batch -> (rows, 128).  Pad only to lane / sublane granularity
    # (<= 1023 elements); the last grid step may be a partial block.
    tile = max(8, (int(tile_rows) // 8) * 8)
    rows = -(-B // LANE)
    if rows > tile and rows % 8:
        rows = -(-rows // 8) * 8
    Bp = rows * LANE
    if Bp != B:
        sig = jnp.pad(sig, ((0, 0), (0, Bp - B)))
    x = sig.reshape(NSIG, rows, LANE)

    out2d = barrier_layer_packed(params, x, tile_rows=tile)
    return out2d.reshape(Bp)[:B].reshape(B, 1)


if __name__ == "__main__":
    key = jax.random.PRNGKey(0)
    B = 8
    k_s, k_v, k_u, k_a = jax.random.split(key, 4)

    # states: plausible spacings (~20 m) and velocities (~15 m/s) for 4 vehicles
    spacings = 20.0 + 2.0 * jax.random.normal(k_s, (B, 4), jnp.float32)
    velocities = 15.0 + 1.0 * jax.random.normal(k_v, (B, 4), jnp.float32)
    states = jnp.concatenate([spacings, velocities], axis=1)          # (B, 8)

    u_nominal = 0.5 * jax.random.normal(k_u, (B, 1), jnp.float32)     # (B, 1)
    acceleration = 0.2 * jax.random.normal(k_a, (B, 8), jnp.float32)  # (B, 8)

    # Deterministic parameter init, matching the module's __init__
    gamma = jnp.array([1.0, 1.0, 1.0], jnp.float32)   # nn.Parameter
    k1 = jnp.array([10.0], jnp.float32)               # nn.Parameter
    tau = 0.1
    CAV_index = 1

    # Force the Pallas path (the dispatcher would pick the jnp fast path at B=8).
    out = barrier_layer(u_nominal, states, acceleration, tau, gamma, k1,
                        cav_index=CAV_index, use_pallas=True)
    out = jax.block_until_ready(out)
    ref = barrier_layer_reference(u_nominal, states, acceleration, tau, gamma, k1,
                                  cav_index=CAV_index)

    assert out.shape == (B, 1) and out.dtype == jnp.float32
    assert jnp.allclose(out, ref, atol=1e-4, rtol=1e-4)
    print("KERNEL_OK")
</pallas_src>

<mosaic_0001>
module attributes {stable_mosaic.version = 11 : i64} {
  func.func @_barrier_kernel(%arg0: i32, %arg1: memref<14xf32, #tpu.memory_space<smem>>, %arg2: memref<9x1x128xf32, #tpu.memory_space<vmem>>, %arg3: memref<1x128xf32, #tpu.memory_space<vmem>>) attributes {dimension_semantics = [#tpu.dimension_semantics<parallel>], iteration_bounds = array<i64: 1>, scalar_prefetch = 0 : i64, scratch_operands = 0 : i64, tpu.core_type = #tpu.core_type<tc>, window_params = [{transform_indices = @transform_0, window_bounds = array<i64: 14>}, {transform_indices = @transform_1, window_bounds = array<i64: 9, 1, 128>}, {transform_indices = @transform_2, window_bounds = array<i64: 1, 128>}]} {
    %c0 = arith.constant 0 : index
    %0 = memref.load %arg1[%c0] : memref<14xf32, #tpu.memory_space<smem>>
    %c1 = arith.constant 1 : index
    %1 = memref.load %arg1[%c1] : memref<14xf32, #tpu.memory_space<smem>>
    %c2 = arith.constant 2 : index
    %2 = memref.load %arg1[%c2] : memref<14xf32, #tpu.memory_space<smem>>
    %c3 = arith.constant 3 : index
    %3 = memref.load %arg1[%c3] : memref<14xf32, #tpu.memory_space<smem>>
    %c4 = arith.constant 4 : index
    %4 = memref.load %arg1[%c4] : memref<14xf32, #tpu.memory_space<smem>>
    %c5 = arith.constant 5 : index
    %5 = memref.load %arg1[%c5] : memref<14xf32, #tpu.memory_space<smem>>
    %c6 = arith.constant 6 : index
    %6 = memref.load %arg1[%c6] : memref<14xf32, #tpu.memory_space<smem>>
    %c7 = arith.constant 7 : index
    %7 = memref.load %arg1[%c7] : memref<14xf32, #tpu.memory_space<smem>>
    %c8 = arith.constant 8 : index
    %8 = memref.load %arg1[%c8] : memref<14xf32, #tpu.memory_space<smem>>
    %c9 = arith.constant 9 : index
    %9 = memref.load %arg1[%c9] : memref<14xf32, #tpu.memory_space<smem>>
    %c10 = arith.constant 10 : index
    %10 = memref.load %arg1[%c10] : memref<14xf32, #tpu.memory_space<smem>>
    %c11 = arith.constant 11 : index
    %11 = memref.load %arg1[%c11] : memref<14xf32, #tpu.memory_space<smem>>
    %c12 = arith.constant 12 : index
    %12 = memref.load %arg1[%c12] : memref<14xf32, #tpu.memory_space<smem>>
    %c13 = arith.constant 13 : index
    %13 = memref.load %arg1[%c13] : memref<14xf32, #tpu.memory_space<smem>>
    %c1_0 = arith.constant 1 : index
    %c0_1 = arith.constant 0 : index
    %c0_2 = arith.constant 0 : index
    %14 = vector.load %arg2[%c1_0, %c0_1, %c0_2] : memref<9x1x128xf32, #tpu.memory_space<vmem>>, vector<1x1x128xf32>
    %15 = vector.shape_cast %14 : vector<1x1x128xf32> to vector<1x128xf32>
    %c2_3 = arith.constant 2 : index
    %c0_4 = arith.constant 0 : index
    %c0_5 = arith.constant 0 : index
    %16 = vector.load %arg2[%c2_3, %c0_4, %c0_5] : memref<9x1x128xf32, #tpu.memory_space<vmem>>, vector<1x1x128xf32>
    %17 = vector.shape_cast %16 : vector<1x1x128xf32> to vector<1x128xf32>
    %18 = arith.subf %17, %15 : vector<1x128xf32>
    %c7_6 = arith.constant 7 : index
    %c0_7 = arith.constant 0 : index
    %c0_8 = arith.constant 0 : index
    %19 = vector.load %arg2[%c7_6, %c0_7, %c0_8] : memref<9x1x128xf32, #tpu.memory_space<vmem>>, vector<1x1x128xf32>
    %20 = vector.shape_cast %19 : vector<1x1x128xf32> to vector<1x128xf32>
    %21 = vector.broadcast %0 : f32 to vector<1x128xf32>
    %22 = arith.mulf %21, %20 : vector<1x128xf32>
    %c0_9 = arith.constant 0 : index
    %c0_10 = arith.constant 0 : index
    %c0_11 = arith.constant 0 : index
    %23 = vector.load %arg2[%c0_9, %c0_10, %c0_11] : memref<9x1x128xf32, #tpu.memory_space<vmem>>, vector<1x1x128xf32>
    %24 = vector.shape_cast %23 : vector<1x1x128xf32> to vector<1x128xf32>
    %25 = vector.broadcast %0 : f32 to vector<1x128xf32>
    %26 = arith.mulf %25, %15 : vector<1x128xf32>
    %27 = arith.subf %24, %26 : vector<1x128xf32>
    %28 = vector.broadcast %1 : f32 to vector<1x128xf32>
    %29 = arith.mulf %28, %27 : vector<1x128xf32>
    %30 = arith.addf %29, %18 : vector<1x128xf32>
    %31 = arith.subf %30, %22 : vector<1x128xf32>
    %c8_12 = arith.constant 8 : index
    %c0_13 = arith.constant 0 : index
    %c0_14 = arith.constant 0 : index
    %32 = vector.load %arg2[%c8_12, %c0_13, %c0_14] : memref<9x1x128xf32, #tpu.memory_space<vmem>>, vector<1x1x128xf32>
    %33 = vector.shape_cast %32 : vector<1x1x128xf32> to vector<1x128xf32>
    %34 = vector.broadcast %4 : f32 to vector<1x128xf32>
    %35 = arith.mulf %34, %18 : vector<1x128xf32>
    %36 = arith.addf %33, %35 : vector<1x128xf32>
    %37 = vector.broadcast %13 : f32 to vector<1x128xf32>
    %38 = arith.addf %36, %37 : vector<1x128xf32>
    %39 = arith.subf %38, %20 : vector<1x128xf32>
    %40 = vector.broadcast %5 : f32 to vector<1x128xf32>
    %41 = arith.mulf %40, %31 : vector<1x128xf32>
    %42 = arith.minimumf %41, %39 : vector<1x128xf32>
    %43 = vector.broadcast %12 : f32 to vector<1x128xf32>
    %44 = arith.addf %43, %22 : vector<1x128xf32>
    %45 = arith.subf %44, %18 : vector<1x128xf32>
    %c3_15 = arith.constant 3 : index
    %c0_16 = arith.constant 0 : index
    %c0_17 = arith.constant 0 : index
    %46 = vector.load %arg2[%c3_15, %c0_16, %c0_17] : memref<9x1x128xf32, #tpu.memory_space<vmem>>, vector<1x1x128xf32>
    %47 = vector.shape_cast %46 : vector<1x1x128xf32> to vector<1x128xf32>
    %c4_18 = arith.constant 4 : index
    %c0_19 = arith.constant 0 : index
    %c0_20 = arith.constant 0 : index
    %48 = vector.load %arg2[%c4_18, %c0_19, %c0_20] : memref<9x1x128xf32, #tpu.memory_space<vmem>>, vector<1x1x128xf32>
    %49 = vector.shape_cast %48 : vector<1x1x128xf32> to vector<1x128xf32>
    %50 = arith.subf %47, %24 : vector<1x128xf32>
    %51 = arith.subf %49, %15 : vector<1x128xf32>
    %52 = vector.broadcast %0 : f32 to vector<1x128xf32>
    %53 = arith.mulf %52, %51 : vector<1x128xf32>
    %54 = arith.subf %50, %53 : vector<1x128xf32>
    %55 = vector.broadcast %2 : f32 to vector<1x128xf32>
    %56 = arith.mulf %55, %54 : vector<1x128xf32>
    %57 = arith.addf %56, %45 : vector<1x128xf32>
    %58 = vector.broadcast %11 : f32 to vector<1x128xf32>
    %59 = arith.mulf %58, %15 : vector<1x128xf32>
    %60 = arith.addf %57, %59 : vector<1x128xf32>
    %61 = vector.broadcast %10 : f32 to vector<1x128xf32>
    %62 = arith.mulf %61, %49 : vector<1x128xf32>
    %63 = arith.addf %60, %62 : vector<1x128xf32>
    %64 = vector.broadcast %9 : f32 to vector<1x128xf32>
    %65 = arith.mulf %64, %47 : vector<1x128xf32>
    %66 = arith.subf %63, %65 : vector<1x128xf32>
    %c5_21 = arith.constant 5 : index
    %c0_22 = arith.constant 0 : index
    %c0_23 = arith.constant 0 : index
    %67 = vector.load %arg2[%c5_21, %c0_22, %c0_23] : memref<9x1x128xf32, #tpu.memory_space<vmem>>, vector<1x1x128xf32>
    %68 = vector.shape_cast %67 : vector<1x1x128xf32> to vector<1x128xf32>
    %c6_24 = arith.constant 6 : index
    %c0_25 = arith.constant 0 : index
    %c0_26 = arith.constant 0 : index
    %69 = vector.load %arg2[%c6_24, %c0_25, %c0_26] : memref<9x1x128xf32, #tpu.memory_space<vmem>>, vector<1x1x128xf32>
    %70 = vector.shape_cast %69 : vector<1x1x128xf32> to vector<1x128xf32>
    %71 = arith.subf %68, %24 : vector<1x128xf32>
    %72 = arith.subf %70, %15 : vector<1x128xf32>
    %73 = vector.broadcast %0 : f32 to vector<1x128xf32>
    %74 = arith.mulf %73, %72 : vector<1x128xf32>
    %75 = arith.subf %71, %74 : vector<1x128xf32>
    %76 = vector.broadcast %3 : f32 to vector<1x128xf32>
    %77 = arith.mulf %76, %75 : vector<1x128xf32>
    %78 = arith.addf %77, %45 : vector<1x128xf32>
    %79 = vector.broadcast %11 : f32 to vector<1x128xf32>
    %80 = arith.mulf %79, %49 : vector<1x128xf32>
    %81 = arith.addf %78, %80 : vector<1x128xf32>
    %82 = vector.broadcast %10 : f32 to vector<1x128xf32>
    %83 = arith.mulf %82, %70 : vector<1x128xf32>
    %84 = arith.addf %81, %83 : vector<1x128xf32>
    %85 = vector.broadcast %9 : f32 to vector<1x128xf32>
    %86 = arith.mulf %85, %68 : vector<1x128xf32>
    %87 = arith.subf %84, %86 : vector<1x128xf32>
    %88 = vector.broadcast %8 : f32 to vector<1x128xf32>
    %89 = arith.mulf %88, %66 : vector<1x128xf32>
    %90 = vector.broadcast %8 : f32 to vector<1x128xf32>
    %91 = arith.mulf %90, %87 : vector<1x128xf32>
    %cst = arith.constant 0.000000e+00 : f32
    %92 = vector.broadcast %cst : f32 to vector<1x128xf32>
    %93 = arith.cmpf oge, %66, %92 : vector<1x128xf32>
    %94 = arith.cmpf ogt, %89, %87 : vector<1x128xf32>
    %cst_27 = arith.constant 0.000000e+00 : f32
    %95 = vector.broadcast %cst_27 : f32 to vector<1x128xf32>
    %96 = arith.cmpf oge, %87, %95 : vector<1x128xf32>
    %97 = arith.andi %93, %96 : vector<1x128xi1>
    %98 = arith.cmpf ogt, %91, %66 : vector<1x128xf32>
    %99 = arith.andi %98, %94 : vector<1x128xi1>
    %cst_28 = arith.constant dense<true> : vector<1x128xi1>
    %100 = arith.xori %93, %cst_28 : vector<1x128xi1>
    %cst_29 = arith.constant dense<true> : vector<1x128xi1>
    %101 = arith.xori %94, %cst_29 : vector<1x128xi1>
    %102 = arith.andi %100, %101 : vector<1x128xi1>
    %103 = arith.addf %66, %87 : vector<1x128xf32>
    %104 = vector.broadcast %7 : f32 to vector<1x128xf32>
    %105 = arith.mulf %104, %103 : vector<1x128xf32>
    %106 = arith.select %102, %66, %87 : vector<1x128xi1>, vector<1x128xf32>
    %107 = vector.broadcast %6 : f32 to vector<1x128xf32>
    %108 = arith.mulf %107, %106 : vector<1x128xf32>
    %109 = arith.select %99, %105, %108 : vector<1x128xi1>, vector<1x128xf32>
    %cst_30 = arith.constant 0.000000e+00 : f32
    %110 = vector.broadcast %cst_30 : f32 to vector<1x128xf32>
    %111 = arith.select %97, %110, %109 : vector<1x128xi1>, vector<1x128xf32>
    %112 = arith.minimumf %111, %42 : vector<1x128xf32>
    %c0_31 = arith.constant 0 : index
    %c0_32 = arith.constant 0 : index
    %113 = vector.load %arg3[%c0_31, %c0_32] : memref<1x128xf32, #tpu.memory_space<vmem>>, vector<1x128xf32>
    tpu.vector_store %arg3[%c0_31, %c0_32], %112 {strides = array<i32>} : memref<1x128xf32, #tpu.memory_space<vmem>>, vector<1x128xf32>,
    return
  }
  func.func @transform_0(%arg0: i32) -> i32 {
    %c0_i32 = arith.constant 0 : i32
    %c0_i32_0 = arith.constant 0 : i32
    return %c0_i32 : i32
  }
  func.func @transform_1(%arg0: i32) -> (i32, i32, i32) {
    %c0_i32 = arith.constant 0 : i32
    %c0_i32_0 = arith.constant 0 : i32
    %c0_i32_1 = arith.constant 0 : i32
    return %c0_i32, %arg0, %c0_i32_0 : i32, i32, i32
  }
  func.func @transform_2(%arg0: i32) -> (i32, i32) {
    %c0_i32 = arith.constant 0 : i32
    %c0_i32_0 = arith.constant 0 : i32
    return %arg0, %c0_i32 : i32, i32
  }
}

</mosaic_0001>

<bundles_post_ra>
// kernel: tpu_custom_call.1
= control target key start
LH: loop header
LB: loop body
LE: loop exit
PB: predicated region body
PF: predicated region fallthrough
CT: control target
= control target key end

     0   :  { %7 = vsyncpa [#allocation5], 0  ;;  %s331_s0 = inlined_call_operand.hbm [shape: f32[14], index: 0, kind: input, shape index: {}]   ;;  %s332_s1 = inlined_call_operand.hbm [shape: f32[9,1,128], index: 1, kind: input, shape index: {}]   ;;  %s333_s2 = inlined_call_operand.hbm [shape: f32[1,128], index: 2, kind: output, shape index: {}]  }
   0x1   :  { %8 = vsyncpa [#allocation3], 0 }
   0x2   :  { %9 = vsyncpa [#allocation4], 0  ;;  %s175_s11 = scalar_lea.hbm %s331_s0, 16 }
   0x3   :  { %p176_p0 = scmp.ne.s32.totalorder %s331_s0, %s175_s11  ;;  %p179_p1 = scmp.lt.u32.totalorder %s175_s11, %s331_s0 }
   0x5   :  { %p181_p2 = pnand %p179_p1, %p176_p0 }
   0x7   :  { %184 = shalt.err (!%p181_p2)
}
   0x8   :  { %s235_s16 = smov [#allocation2]   ;;  %s236_s19 = smov [#allocation6]  }
   0x9   :  { %17 = dma.hbm_to_smem %s331_s0, 16, %s235_s16, [#allocation5]  }
   0xa   :  { %s23_s20 = sshll.u32 %s236_s19, 4  ;;  %s185_s23 = scalar_lea.hbm %s332_s1, 144  ;;  %s24_s20 = int_to_ptr.vmem [resolvable:$true] %s23_s20 }
   0xb   :  { %p186_p3 = scmp.ne.s32.totalorder %s332_s1, %s185_s23  ;;  %p189_p4 = scmp.lt.u32.totalorder %s185_s23, %s332_s1 }
   0xd   :  { %p191_p5 = pnand %p189_p4, %p186_p3 }
   0xf   :  { %194 = shalt.err (!%p191_p5)
}
  0x10   :  { %s195_s28 = scalar_lea.vmem %s24_s20, 144  ;;  %s199_s0 = scalar_lea.vmem %s24_s20, 160 }
  0x11   :  { %p196_p6 = scmp.ne.s32.totalorder %s24_s20, %s195_s28  ;;  %p200_p7 = scmp.lt.s32.totalorder %s24_s20, %s24_s20 }
  0x12   :  { %p201_p8 = scmp.lt.s32.totalorder %s199_s0, %s195_s28 }
  0x14   :  { %p202_p9 = por %p201_p8, %p200_p7 }
  0x16   :  { %p203_p10 = pnand %p202_p9, %p196_p6 }
  0x18   :  { %206 = shalt.err (!%p203_p10)
}
  0x19   :  { %s237_s29 = smov 16   ;;  %s238_s30 = smov 1  }
  0x1a   :  { %29 = dma.hbm_to_vmem [thread:$0]  %s332_s1, 144, %s24_s20, [#allocation3], %s237_s29, %s237_s29, %s238_s30  }
  0x1b   :  { %229 = dma.done.wait [#allocation5], 16  }
  0x1c   :  { %230 = vsyncadd [#allocation5], 4294967280 }
  0x1d   :  { %231 = dma.done.wait [#allocation3], 144  }
  0x1e   :  { %232 = vsyncadd [#allocation3], 4294967152 }
  0x1f   :  { %36 = sfence }
  0x20   :  { %s37_s5 = sld [smem:[#allocation2]]  ;;  %s280_s6 = sld [smem:[#allocation2 + $0x2]]  ;;  %v52_v0 = vld [vmem:[#allocation6 + $0x1] sm:$0x1]  ;;  %v60_v1 = vld [vmem:[#allocation6] sm:$0x1] }
  0x21   :  { %s282_s7 = sld [smem:[#allocation2 + $0x1]]  ;;  %s284_s8 = sld [smem:[#allocation2 + $0x3]]  ;;  %v290_v2 = vld [vmem:[#allocation6 + $0x7] sm:$0x1]  ;;  %v82_v3 = vld [vmem:[#allocation6 + $0x3] sm:$0x1] }
  0x22   :  { %s286_s9 = sld [smem:[#allocation2 + $0x4]]  ;;  %s288_s10 = sld [smem:[#allocation2 + $0xb]]  ;;  %v84_v5 = vld [vmem:[#allocation6 + $0x4] sm:$0x1]  ;;  %v85_v6 = vsub.f32 %v82_v3, %v60_v1  ;;  %v102_v8 = vld [vmem:[#allocation6 + $0x5] sm:$0x1] }
  0x23   :  { %s292_s1 = sld [smem:[#allocation2 + $0xa]]  ;;  %s167_s11 = sld [smem:[#allocation2 + $0xc]]  ;;  %v86_v7 = vsub.f32 %v84_v5, %v52_v0  ;;  %v104_v9 = vld [vmem:[#allocation6 + $0x6] sm:$0x1]  ;;  %v54_v10 = vld [vmem:[#allocation6 + $0x2] sm:$0x1]  ;;  %v105_v16 = vsub.f32 %v102_v8, %v60_v1 }
  0x24   :  { %s294_s12 = sld [smem:[#allocation2 + $0x9]]  ;;  %v106_v12 = vsub.f32 %v104_v9, %v52_v0  ;;  %v55_v18 = vsub.f32 %v54_v10, %v52_v0  ;;  %s300_s13 = sld [smem:[#allocation2 + $0xd]]  ;;  %v68_v37 = vld [vmem:[#allocation6 + $0x8] sm:$0x1]  ;;  %vm239_vm2 = vmmov 1  }
  0x25   :  { %s304_s14 = sld [smem:[#allocation2 + $0x8]]  ;;  %s308_s15 = sld [smem:[#allocation2 + $0x5]] }
  0x26   :  { %v58_v4 = vstv %s37_s5  ;;  %v89_v15 = vstv %s280_s6  ;;  %s310_s16 = sld [smem:[#allocation2 + $0x7]]  ;;  %s161_s17 = sld [smem:[#allocation2 + $0x6]] }
  0x27   :  { %v61_v11 = vmul.f32 %v58_v4, %v52_v0  ;;  %v59_v13 = vmul.f32 %v58_v4, %v290_v2  ;;  %v87_v14 = vmul.f32 %v86_v7, %v58_v4  ;;  %v107_v17 = vmul.f32 %v106_v12, %v58_v4  ;;  %s240_s18 = smov [#allocation7]  }
  0x28   :  { %v69_v21 = vstv %s286_s9  ;;  %v92_v23 = vstv %s288_s10  ;;  %v63_v24 = vstv %s282_s7  ;;  %v109_v27 = vstv %s284_s8  ;;  %s146_s19 = sshll.u32 %s240_s18, 4  ;;  %s147_s19 = int_to_ptr.vmem [resolvable:$true] %s146_s19 }
  0x29   :  { %v88_v19 = vsub.f32 %v85_v6, %v87_v14  ;;  %v62_v20 = vsub.f32 %v60_v1, %v61_v11  ;;  %v78_v22 = vstv %s167_s11  ;;  %v95_v28 = vstv %s292_s1  ;;  %s207_s20 = scalar_lea.vmem %s147_s19, 16  ;;  %s211_s21 = scalar_lea.vmem %s147_s19, 32 }
  0x2a   :  { %v79_v25 = vadd.f32 %v78_v22, %v59_v13  ;;  %v108_v29 = vsub.f32 %v105_v16, %v107_v17  ;;  %v70_v30 = vmul.f32 %v69_v21, %v55_v18  ;;  %v93_v32 = vmul.f32 %v92_v23, %v52_v0  ;;  %p208_p11 = scmp.ne.s32.totalorder %s147_s19, %s207_s20  ;;  %p212_p12 = scmp.lt.s32.totalorder %s147_s19, %s147_s19 }
  0x2b   :  { %v90_v26 = vmul.f32 %v89_v15, %v88_v19  ;;  %v64_v33 = vmul.f32 %v63_v24, %v62_v20  ;;  %v98_v34 = vstv %s294_s12  ;;  %v112_v36 = vmul.f32 %v92_v23, %v84_v5  ;;  %p213_p13 = scmp.lt.s32.totalorder %s211_s21, %s207_s20 }
  0x2c   :  { %v80_v31 = vsub.f32 %v79_v25, %v55_v18  ;;  %v110_v35 = vmul.f32 %v109_v27, %v108_v29  ;;  %v96_v39 = vmul.f32 %v95_v28, %v84_v5  ;;  %v114_v41 = vmul.f32 %v104_v9, %v95_v28 }
  0x2d   :  { %v99_v43 = vmul.f32 %v98_v34, %v82_v3  ;;  %v65_v44 = vadd.f32 %v64_v33, %v55_v18  ;;  %v71_v45 = vadd.f32 %v70_v30, %v68_v37  ;;  %v116_v47 = vmul.f32 %v102_v8, %v98_v34  ;;  %p214_p0 = por %p213_p13, %p212_p12 }
  0x2e   :  { %v91_v38 = vadd.f32 %v90_v26, %v80_v31  ;;  %v111_v40 = vadd.f32 %v110_v35, %v80_v31  ;;  %v72_v48 = vstv %s300_s13  ;;  %v118_v51 = vstv %s304_s14 }
  0x2f   :  { %v66_v53 = vsub.f32 %v65_v44, %v59_v13  ;;  %v73_v54 = vadd.f32 %v72_v48, %v71_v45  ;;  %v75_v56 = vstv %s308_s15  ;;  %v131_v60 = vstv %s310_s16  ;;  %p215_p1 = pnand %p214_p0, %p208_p11 }
  0x30   :  { %v94_v42 = vadd.f32 %v93_v32, %v91_v38  ;;  %v113_v46 = vadd.f32 %v112_v36, %v111_v40  ;;  %v134_v63 = vstv %s161_s17 }
  0x31   :  { %v74_v61 = vsub.f32 %v73_v54, %v290_v2  ;;  %v76_v62 = vmul.f32 %v75_v56, %v66_v53 }
  0x32   :  { %v97_v49 = vadd.f32 %v96_v39, %v94_v42  ;;  %v115_v50 = vadd.f32 %v114_v41, %v113_v46 }
  0x33   :  { %v77_v3 = vmin.f32 %v76_v62, %v74_v61 }
  0x34   :  { %v100_v52 = vsub.f32 %v97_v49, %v99_v43  ;;  %v117_v55 = vsub.f32 %v115_v50, %v116_v47 }
  0x36   :  { %v119_v57 = vmul.f32 %v118_v51, %v100_v52  ;;  %vm121_vm0 = vcmp.ge.f32.partialorder %v100_v52, 0.0  ;;  %v120_v58 = vmul.f32 %v118_v51, %v117_v55  ;;  %v130_v59 = vadd.f32 %v117_v55, %v100_v52 }
  0x37   :  { %vm127_vm3 = vmxor %vm121_vm0, %vm239_vm2  ;;  %vm123_vm6 = vcmp.ge.f32.partialorder %v117_v55, 0.0 }
  0x38   :  { %vm122_vm1 = vcmp.gt.f32.partialorder %v119_v57, %v117_v55  ;;  %vm125_vm4 = vcmp.gt.f32.partialorder %v120_v58, %v100_v52  ;;  %v132_v0 = vmul.f32 %v131_v60, %v130_v59  ;;  %vm124_vm9 = vmand %vm121_vm0, %vm123_vm6 }
  0x39   :  { %vm128_vm5 = vmxor %vm122_vm1, %vm239_vm2 }
  0x3a   :  { %vm129_vm7 = vmand %vm127_vm3, %vm128_vm5 }
  0x3b   :  { %vm126_vm8 = vmand %vm125_vm4, %vm122_vm1  ;;  %v133_v1 = vsel %vm129_vm7, %v100_v52, %v117_v55 }
  0x3c   :  { %v135_v4 = vmul.f32 %v134_v63, %v133_v1 }
  0x3e   :  { %v136_v5 = vsel %vm126_vm8, %v132_v0, %v135_v4 }
  0x3f   :  { %v137_v6 = vsel %vm124_vm9, 0.0, %v136_v5 }
  0x40   :  { %v138_v7 = vmin.f32 %v137_v6, %v77_v3 }
  0x42   :  { %139 = vst [vmem:[#allocation7] sm:$0x1] %v138_v7 }
  0x43   :  { %218 = shalt.err (!%p215_p1)
}
  0x44   :  { %s219_s24 = scalar_lea.hbm %s333_s2, 16 }
  0x45   :  { %p220_p2 = scmp.ne.s32.totalorder %s333_s2, %s219_s24  ;;  %p223_p3 = scmp.lt.u32.totalorder %s219_s24, %s333_s2 }
  0x47   :  { %p225_p4 = pnand %p223_p3, %p220_p2 }
  0x49   :  { %228 = shalt.err (!%p225_p4)
}
  0x4a   :  { %149 = dma.vmem_to_hbm [thread:$0]  %s147_s19, 16, %s333_s2, [#allocation4]  }
  0x4b   :  { %233 = dma.done.wait [#allocation4], 16  }
  0x4c   :  { %234 = vsyncadd [#allocation4], 4294967280 }
  0x4d   :  { %153 = vsyncpa [#allocation3], 1 }
  0x4e   :  { %154 = vsyncpa [#allocation4], 1 }
  0x4f   :  { %155 = vsyncpa [#allocation5], 1 }

</bundles_post_ra>
